<compile_context>
chip_gen: v7x
topology: tpu7x:2x2x1
jax: 0.10.0
libtpu: 0.0.40
codegen_flags: <defaults>
</compile_context>

<pallas_src>
import jax
import jax.numpy as jnp
from jax.experimental import pallas as pl
from jax.experimental.pallas import tpu as pltpu


# ----------------------------------------------------------------------------
# Fixed DFT round-trip matrices:  irfft( proj( rfft(x, dim=-2) ), dim=-2 )
# == M1 @ x @ W_real + M2 @ x @ W_imag            (exact for even L)
# ----------------------------------------------------------------------------
def _build_dft_matrices(L):
    l = jnp.arange(L, dtype=jnp.float32)
    f = jnp.arange(L // 2 + 1, dtype=jnp.float32)

    # rfft:  Re X = cos_fl @ x,  Im X = sin_fl @ x
    ang_fl = 2.0 * jnp.pi * f[:, None] * l[None, :] / L           # (F, L)
    cos_fl = jnp.cos(ang_fl)
    sin_fl = -jnp.sin(ang_fl)

    # irfft (n = L, even):  y = cr_t @ Re(Y) + ci_t @ Im(Y)
    c = jnp.where((f == 0) | (f == L // 2), 1.0, 2.0) / L          # (F,)
    ang_lf = 2.0 * jnp.pi * l[:, None] * f[None, :] / L            # (L, F)
    cr_t = c[None, :] * jnp.cos(ang_lf)
    ci_t = -c[None, :] * jnp.sin(ang_lf)

    m1 = cr_t @ cos_fl                                             # (L, L)
    m2 = ci_t @ sin_fl                                             # (L, L)
    return m1.astype(jnp.float32), m2.astype(jnp.float32)


# ----------------------------------------------------------------------------
# Fused kernel: (per batch row)  DFT-dots -> projection dots -> LayerNorm
# ----------------------------------------------------------------------------
def _fused_token_embedding_kernel(x_ref, m1_ref, m2_ref, wr_ref, wi_ref,
                                  g_ref, b_ref, o_ref):
    # Resident operands, loaded once per grid step (hoisted out of the batch loop).
    m1 = m1_ref[...]                                               # (L, L)  f32
    m2 = m2_ref[...]                                               # (L, L)  f32
    wr = wr_ref[...]                                               # (C, D)  f32
    wi = wi_ref[...]                                               # (C, D)  f32
    g = g_ref[...]                                                 # (1, D)  f32
    b = b_ref[...]                                                 # (1, D)  f32

    bb_rows = x_ref.shape[0]                                       # static batch block
    for bb in range(bb_rows):                                      # statically unrolled
        x = x_ref[bb]                                              # (L, C)  f32

        # rfft/irfft round trip per weight path (f32 on the MXU).
        ar = jnp.dot(m1, x, preferred_element_type=jnp.float32)    # (L, C)
        ai = jnp.dot(m2, x, preferred_element_type=jnp.float32)    # (L, C)

        # Complex linear projection: ar @ Wr + ai @ Wi   -> (L, D), f32 accumulate.
        y = (jnp.dot(ar, wr, preferred_element_type=jnp.float32)
             + jnp.dot(ai, wi, preferred_element_type=jnp.float32))

        # LayerNorm(d_model), eps = 1e-5 (torch default), biased variance.
        mean = jnp.mean(y, axis=-1, keepdims=True)
        var = jnp.mean((y - mean) ** 2, axis=-1, keepdims=True)
        yn = (y - mean) * jax.lax.rsqrt(var + 1e-5)
        o_ref[bb] = yn * g + b


def _pick_batch_block(B):
    for bb in (8, 4, 2, 1):
        if B % bb == 0:
            return bb
    return 1


# ----------------------------------------------------------------------------
# TokenEmbedding forward (fc_linear branch)
# ----------------------------------------------------------------------------
def token_embedding_forward(x, w_real, w_imag, gamma, beta):
    B, L, C = x.shape
    D = w_real.shape[1]
    assert L % 2 == 0, "irfft(rfft(x)) round-trip at length L assumes even L"

    m1, m2 = _build_dft_matrices(L)                                # (L, L) x2, f32
    wr = w_real.astype(jnp.float32)                                # (C, D)
    wi = w_imag.astype(jnp.float32)                                # (C, D)
    g2 = gamma.reshape(1, D).astype(jnp.float32)
    b2 = beta.reshape(1, D).astype(jnp.float32)
    x = x.astype(jnp.float32)

    BB = _pick_batch_block(B)
    grid = (B // BB,)

    # Advisory cost estimate so XLA can schedule around this custom call.
    flops = B * (2 * (2 * L * L * C) + 2 * (2 * L * C * D) + 10 * L * D)
    bytes_accessed = (B * L * C + B * L * D + 2 * L * L + 2 * C * D + 2 * D) * 4
    cost = pl.CostEstimate(flops=flops, transcendentals=B * L,
                           bytes_accessed=bytes_accessed)

    y = pl.pallas_call(
        _fused_token_embedding_kernel,
        out_shape=jax.ShapeDtypeStruct((B, L, D), jnp.float32),
        grid=grid,
        in_specs=[
            pl.BlockSpec((BB, L, C), lambda i: (i, 0, 0)),          # x (batch block)
            pl.BlockSpec((L, L), lambda i: (0, 0)),                 # M1 (resident)
            pl.BlockSpec((L, L), lambda i: (0, 0)),                 # M2 (resident)
            pl.BlockSpec((C, D), lambda i: (0, 0)),                 # W_real (resident)
            pl.BlockSpec((C, D), lambda i: (0, 0)),                 # W_imag (resident)
            pl.BlockSpec((1, D), lambda i: (0, 0)),                 # gamma
            pl.BlockSpec((1, D), lambda i: (0, 0)),                 # beta
        ],
        out_specs=pl.BlockSpec((BB, L, D), lambda i: (i, 0, 0)),
        compiler_params=pltpu.CompilerParams(
            dimension_semantics=("parallel",),        # megacore on v7x
            vmem_limit_bytes=32 * 1024 * 1024,        # safe on v5e/v6e/v7x
        ),
        cost_estimate=cost,
    )(x, m1, m2, wr, wi, g2, b2)

    # With a single 'fc_linear' branch the residual is recorded but never used.
    latent_list = [y]
    return y, latent_list


# ----------------------------------------------------------------------------
# Pure-JAX reference (actual FFTs, all f32) for a sanity check
# ----------------------------------------------------------------------------
def reference_forward(x, w_real, w_imag, gamma, beta):
    B, L, C = x.shape
    xf = jnp.fft.rfft(x.astype(jnp.float32), axis=-2)
    yf = jnp.real(xf) @ w_real + 1j * (jnp.imag(xf) @ w_imag)
    y = jnp.fft.irfft(yf, n=L, axis=-2)
    mean = jnp.mean(y, axis=-1, keepdims=True)
    var = jnp.mean((y - mean) ** 2, axis=-1, keepdims=True)
    return (y - mean) * jax.lax.rsqrt(var + 1e-5) * gamma + beta


if __name__ == "__main__":
    # Small shapes consistent with the module: B=2, L=16 (window), C=in_dim=4,
    # d_model=32.
    B, L, C, D = 2, 16, 4, 32

    key = jax.random.PRNGKey(0)
    kx, kwr, kwi = jax.random.split(key, 3)

    x = jax.random.normal(kx, (B, L, C), dtype=jnp.float32)

    # nn.Linear(in_dim, d_model, bias=False) x2, init normal(0, gain=0.02);
    # stored here as (in, out) so y = x @ W.
    gain = 0.02
    w_real = gain * jax.random.normal(kwr, (C, D), dtype=jnp.float32)
    w_imag = gain * jax.random.normal(kwi, (C, D), dtype=jnp.float32)

    # nn.LayerNorm(d_model): gamma=1, beta=0
    gamma = jnp.ones((D,), dtype=jnp.float32)
    beta = jnp.zeros((D,), dtype=jnp.float32)

    out, latents = token_embedding_forward(x, w_real, w_imag, gamma, beta)
    out = jax.block_until_ready(out)

    ref = reference_forward(x, w_real, w_imag, gamma, beta)
    assert out.shape == (B, L, D)
    assert len(latents) == 1 and latents[0].shape == (B, L, D)
    # All-f32 path: matches the FFT-based reference to float32 round-off.
    assert jnp.allclose(out, ref, atol=1e-3, rtol=1e-3), float(
        jnp.max(jnp.abs(out - ref)))

    print("KERNEL_OK")
</pallas_src>

<mosaic_0001>
module attributes {stable_mosaic.version = 11 : i64} {
  func.func @_fused_token_embedding_kernel(%arg0: i32, %arg1: memref<2x16x4xf32, #tpu.memory_space<vmem>>, %arg2: memref<16x16xf32, #tpu.memory_space<vmem>>, %arg3: memref<16x16xf32, #tpu.memory_space<vmem>>, %arg4: memref<4x32xf32, #tpu.memory_space<vmem>>, %arg5: memref<4x32xf32, #tpu.memory_space<vmem>>, %arg6: memref<1x32xf32, #tpu.memory_space<vmem>>, %arg7: memref<1x32xf32, #tpu.memory_space<vmem>>, %arg8: memref<2x16x32xf32, #tpu.memory_space<vmem>>) attributes {dimension_semantics = [#tpu.dimension_semantics<parallel>], iteration_bounds = array<i64: 1>, scalar_prefetch = 0 : i64, scratch_operands = 0 : i64, tpu.core_type = #tpu.core_type<tc>, window_params = [{transform_indices = @transform_0, window_bounds = array<i64: 2, 16, 4>}, {pipeline_mode = #tpu.pipeline_mode<synchronous>, transform_indices = @transform_1, window_bounds = array<i64: 16, 16>}, {pipeline_mode = #tpu.pipeline_mode<synchronous>, transform_indices = @transform_2, window_bounds = array<i64: 16, 16>}, {pipeline_mode = #tpu.pipeline_mode<synchronous>, transform_indices = @transform_3, window_bounds = array<i64: 4, 32>}, {pipeline_mode = #tpu.pipeline_mode<synchronous>, transform_indices = @transform_4, window_bounds = array<i64: 4, 32>}, {pipeline_mode = #tpu.pipeline_mode<synchronous>, transform_indices = @transform_5, window_bounds = array<i64: 1, 32>}, {pipeline_mode = #tpu.pipeline_mode<synchronous>, transform_indices = @transform_6, window_bounds = array<i64: 1, 32>}, {transform_indices = @transform_7, window_bounds = array<i64: 2, 16, 32>}]} {
    %c0 = arith.constant 0 : index
    %c0_0 = arith.constant 0 : index
    %0 = vector.load %arg2[%c0, %c0_0] : memref<16x16xf32, #tpu.memory_space<vmem>>, vector<16x16xf32>
    %c0_1 = arith.constant 0 : index
    %c0_2 = arith.constant 0 : index
    %1 = vector.load %arg3[%c0_1, %c0_2] : memref<16x16xf32, #tpu.memory_space<vmem>>, vector<16x16xf32>
    %c0_3 = arith.constant 0 : index
    %c0_4 = arith.constant 0 : index
    %2 = vector.load %arg4[%c0_3, %c0_4] : memref<4x32xf32, #tpu.memory_space<vmem>>, vector<4x32xf32>
    %c0_5 = arith.constant 0 : index
    %c0_6 = arith.constant 0 : index
    %3 = vector.load %arg5[%c0_5, %c0_6] : memref<4x32xf32, #tpu.memory_space<vmem>>, vector<4x32xf32>
    %c0_7 = arith.constant 0 : index
    %c0_8 = arith.constant 0 : index
    %4 = vector.load %arg6[%c0_7, %c0_8] : memref<1x32xf32, #tpu.memory_space<vmem>>, vector<1x32xf32>
    %c0_9 = arith.constant 0 : index
    %c0_10 = arith.constant 0 : index
    %5 = vector.load %arg7[%c0_9, %c0_10] : memref<1x32xf32, #tpu.memory_space<vmem>>, vector<1x32xf32>
    %c0_11 = arith.constant 0 : index
    %c0_12 = arith.constant 0 : index
    %c0_13 = arith.constant 0 : index
    %6 = vector.load %arg1[%c0_11, %c0_12, %c0_13] : memref<2x16x4xf32, #tpu.memory_space<vmem>>, vector<1x16x4xf32>
    %7 = vector.shape_cast %6 : vector<1x16x4xf32> to vector<16x4xf32>
    %cst = arith.constant dense<0.000000e+00> : vector<16x4xf32>
    %8 = tpu.matmul %0, %7, %cst {dimension_numbers = #tpu.dot_dimension_numbers<[1], [0], [0], [1], [0, 0, 1, 1], [], []>} : vector<16x16xf32>, vector<16x4xf32>, vector<16x4xf32> -> vector<16x4xf32>
    %cst_14 = arith.constant dense<0.000000e+00> : vector<16x4xf32>
    %9 = tpu.matmul %1, %7, %cst_14 {dimension_numbers = #tpu.dot_dimension_numbers<[1], [0], [0], [1], [0, 0, 1, 1], [], []>} : vector<16x16xf32>, vector<16x4xf32>, vector<16x4xf32> -> vector<16x4xf32>
    %cst_15 = arith.constant dense<0.000000e+00> : vector<16x32xf32>
    %10 = tpu.matmul %8, %2, %cst_15 {dimension_numbers = #tpu.dot_dimension_numbers<[1], [0], [0], [1], [0, 0, 1, 1], [], []>} : vector<16x4xf32>, vector<4x32xf32>, vector<16x32xf32> -> vector<16x32xf32>
    %cst_16 = arith.constant dense<0.000000e+00> : vector<16x32xf32>
    %11 = tpu.matmul %9, %3, %cst_16 {dimension_numbers = #tpu.dot_dimension_numbers<[1], [0], [0], [1], [0, 0, 1, 1], [], []>} : vector<16x4xf32>, vector<4x32xf32>, vector<16x32xf32> -> vector<16x32xf32>
    %12 = arith.addf %10, %11 : vector<16x32xf32>
    %cst_17 = arith.constant dense<0.000000e+00> : vector<16xf32>
    %13 = vector.multi_reduction <add>, %12, %cst_17 [1] : vector<16x32xf32> to vector<16xf32>
    %14 = vector.shape_cast %13 : vector<16xf32> to vector<16x1xf32>
    %cst_18 = arith.constant 3.200000e+01 : f32
    %15 = vector.broadcast %cst_18 : f32 to vector<16x1xf32>
    %16 = arith.divf %14, %15 : vector<16x1xf32>
    %17 = vector.broadcast %16 : vector<16x1xf32> to vector<16x32xf32>
    %18 = arith.subf %12, %17 : vector<16x32xf32>
    %19 = arith.mulf %18, %18 : vector<16x32xf32>
    %cst_19 = arith.constant dense<0.000000e+00> : vector<16xf32>
    %20 = vector.multi_reduction <add>, %19, %cst_19 [1] : vector<16x32xf32> to vector<16xf32>
    %21 = vector.shape_cast %20 : vector<16xf32> to vector<16x1xf32>
    %cst_20 = arith.constant 3.200000e+01 : f32
    %22 = vector.broadcast %cst_20 : f32 to vector<16x1xf32>
    %23 = arith.divf %21, %22 : vector<16x1xf32>
    %24 = vector.broadcast %16 : vector<16x1xf32> to vector<16x32xf32>
    %25 = arith.subf %12, %24 : vector<16x32xf32>
    %cst_21 = arith.constant 9.99999974E-6 : f32
    %26 = vector.broadcast %cst_21 : f32 to vector<16x1xf32>
    %27 = arith.addf %23, %26 : vector<16x1xf32>
    %28 = math.rsqrt %27 : vector<16x1xf32>
    %29 = vector.broadcast %28 : vector<16x1xf32> to vector<16x32xf32>
    %30 = arith.mulf %25, %29 : vector<16x32xf32>
    %31 = vector.broadcast %4 : vector<1x32xf32> to vector<16x32xf32>
    %32 = arith.mulf %30, %31 : vector<16x32xf32>
    %33 = vector.broadcast %5 : vector<1x32xf32> to vector<16x32xf32>
    %34 = arith.addf %32, %33 : vector<16x32xf32>
    %c0_22 = arith.constant 0 : index
    %c0_23 = arith.constant 0 : index
    %c0_24 = arith.constant 0 : index
    %35 = vector.load %arg8[%c0_22, %c0_23, %c0_24] : memref<2x16x32xf32, #tpu.memory_space<vmem>>, vector<1x16x32xf32>
    %36 = vector.shape_cast %35 : vector<1x16x32xf32> to vector<16x32xf32>
    %37 = vector.shape_cast %34 : vector<16x32xf32> to vector<1x16x32xf32>
    tpu.vector_store %arg8[%c0_22, %c0_23, %c0_24], %37 {strides = array<i32>} : memref<2x16x32xf32, #tpu.memory_space<vmem>>, vector<1x16x32xf32>,
    %c1 = arith.constant 1 : index
    %c0_25 = arith.constant 0 : index
    %c0_26 = arith.constant 0 : index
    %38 = vector.load %arg1[%c1, %c0_25, %c0_26] : memref<2x16x4xf32, #tpu.memory_space<vmem>>, vector<1x16x4xf32>
    %39 = vector.shape_cast %38 : vector<1x16x4xf32> to vector<16x4xf32>
    %cst_27 = arith.constant dense<0.000000e+00> : vector<16x4xf32>
    %40 = tpu.matmul %0, %39, %cst_27 {dimension_numbers = #tpu.dot_dimension_numbers<[1], [0], [0], [1], [0, 0, 1, 1], [], []>} : vector<16x16xf32>, vector<16x4xf32>, vector<16x4xf32> -> vector<16x4xf32>
    %cst_28 = arith.constant dense<0.000000e+00> : vector<16x4xf32>
    %41 = tpu.matmul %1, %39, %cst_28 {dimension_numbers = #tpu.dot_dimension_numbers<[1], [0], [0], [1], [0, 0, 1, 1], [], []>} : vector<16x16xf32>, vector<16x4xf32>, vector<16x4xf32> -> vector<16x4xf32>
    %cst_29 = arith.constant dense<0.000000e+00> : vector<16x32xf32>
    %42 = tpu.matmul %40, %2, %cst_29 {dimension_numbers = #tpu.dot_dimension_numbers<[1], [0], [0], [1], [0, 0, 1, 1], [], []>} : vector<16x4xf32>, vector<4x32xf32>, vector<16x32xf32> -> vector<16x32xf32>
    %cst_30 = arith.constant dense<0.000000e+00> : vector<16x32xf32>
    %43 = tpu.matmul %41, %3, %cst_30 {dimension_numbers = #tpu.dot_dimension_numbers<[1], [0], [0], [1], [0, 0, 1, 1], [], []>} : vector<16x4xf32>, vector<4x32xf32>, vector<16x32xf32> -> vector<16x32xf32>
    %44 = arith.addf %42, %43 : vector<16x32xf32>
    %cst_31 = arith.constant dense<0.000000e+00> : vector<16xf32>
    %45 = vector.multi_reduction <add>, %44, %cst_31 [1] : vector<16x32xf32> to vector<16xf32>
    %46 = vector.shape_cast %45 : vector<16xf32> to vector<16x1xf32>
    %cst_32 = arith.constant 3.200000e+01 : f32
    %47 = vector.broadcast %cst_32 : f32 to vector<16x1xf32>
    %48 = arith.divf %46, %47 : vector<16x1xf32>
    %49 = vector.broadcast %48 : vector<16x1xf32> to vector<16x32xf32>
    %50 = arith.subf %44, %49 : vector<16x32xf32>
    %51 = arith.mulf %50, %50 : vector<16x32xf32>
    %cst_33 = arith.constant dense<0.000000e+00> : vector<16xf32>
    %52 = vector.multi_reduction <add>, %51, %cst_33 [1] : vector<16x32xf32> to vector<16xf32>
    %53 = vector.shape_cast %52 : vector<16xf32> to vector<16x1xf32>
    %cst_34 = arith.constant 3.200000e+01 : f32
    %54 = vector.broadcast %cst_34 : f32 to vector<16x1xf32>
    %55 = arith.divf %53, %54 : vector<16x1xf32>
    %56 = vector.broadcast %48 : vector<16x1xf32> to vector<16x32xf32>
    %57 = arith.subf %44, %56 : vector<16x32xf32>
    %cst_35 = arith.constant 9.99999974E-6 : f32
    %58 = vector.broadcast %cst_35 : f32 to vector<16x1xf32>
    %59 = arith.addf %55, %58 : vector<16x1xf32>
    %60 = math.rsqrt %59 : vector<16x1xf32>
    %61 = vector.broadcast %60 : vector<16x1xf32> to vector<16x32xf32>
    %62 = arith.mulf %57, %61 : vector<16x32xf32>
    %63 = vector.broadcast %4 : vector<1x32xf32> to vector<16x32xf32>
    %64 = arith.mulf %62, %63 : vector<16x32xf32>
    %65 = vector.broadcast %5 : vector<1x32xf32> to vector<16x32xf32>
    %66 = arith.addf %64, %65 : vector<16x32xf32>
    %c1_36 = arith.constant 1 : index
    %c0_37 = arith.constant 0 : index
    %c0_38 = arith.constant 0 : index
    %67 = vector.load %arg8[%c1_36, %c0_37, %c0_38] : memref<2x16x32xf32, #tpu.memory_space<vmem>>, vector<1x16x32xf32>
    %68 = vector.shape_cast %67 : vector<1x16x32xf32> to vector<16x32xf32>
    %69 = vector.shape_cast %66 : vector<16x32xf32> to vector<1x16x32xf32>
    tpu.vector_store %arg8[%c1_36, %c0_37, %c0_38], %69 {strides = array<i32>} : memref<2x16x32xf32, #tpu.memory_space<vmem>>, vector<1x16x32xf32>,
    return
  }
  func.func @transform_0(%arg0: i32) -> (i32, i32, i32) {
    %c0_i32 = arith.constant 0 : i32
    %c0_i32_0 = arith.constant 0 : i32
    %c0_i32_1 = arith.constant 0 : i32
    return %arg0, %c0_i32, %c0_i32_0 : i32, i32, i32
  }
  func.func @transform_1(%arg0: i32) -> (i32, i32) {
    %c0_i32 = arith.constant 0 : i32
    %c0_i32_0 = arith.constant 0 : i32
    %c0_i32_1 = arith.constant 0 : i32
    return %c0_i32, %c0_i32_0 : i32, i32
  }
  func.func @transform_2(%arg0: i32) -> (i32, i32) {
    %c0_i32 = arith.constant 0 : i32
    %c0_i32_0 = arith.constant 0 : i32
    %c0_i32_1 = arith.constant 0 : i32
    return %c0_i32, %c0_i32_0 : i32, i32
  }
  func.func @transform_3(%arg0: i32) -> (i32, i32) {
    %c0_i32 = arith.constant 0 : i32
    %c0_i32_0 = arith.constant 0 : i32
    %c0_i32_1 = arith.constant 0 : i32
    return %c0_i32, %c0_i32_0 : i32, i32
  }
  func.func @transform_4(%arg0: i32) -> (i32, i32) {
    %c0_i32 = arith.constant 0 : i32
    %c0_i32_0 = arith.constant 0 : i32
    %c0_i32_1 = arith.constant 0 : i32
    return %c0_i32, %c0_i32_0 : i32, i32
  }
  func.func @transform_5(%arg0: i32) -> (i32, i32) {
    %c0_i32 = arith.constant 0 : i32
    %c0_i32_0 = arith.constant 0 : i32
    %c0_i32_1 = arith.constant 0 : i32
    return %c0_i32, %c0_i32_0 : i32, i32
  }
  func.func @transform_6(%arg0: i32) -> (i32, i32) {
    %c0_i32 = arith.constant 0 : i32
    %c0_i32_0 = arith.constant 0 : i32
    %c0_i32_1 = arith.constant 0 : i32
    return %c0_i32, %c0_i32_0 : i32, i32
  }
  func.func @transform_7(%arg0: i32) -> (i32, i32, i32) {
    %c0_i32 = arith.constant 0 : i32
    %c0_i32_0 = arith.constant 0 : i32
    %c0_i32_1 = arith.constant 0 : i32
    return %arg0, %c0_i32, %c0_i32_0 : i32, i32, i32
  }
}

</mosaic_0001>

<bundles_post_ra>
// kernel: tpu_custom_call.1
= control target key start
LH: loop header
LB: loop body
LE: loop exit
PB: predicated region body
PF: predicated region fallthrough
CT: control target
= control target key end

     0   :  { %vm37_vm0 = vcmask 130048   ;;  %s1062_s0 = inlined_call_operand.vmem [shape: f32[2,16,4], index: 0, kind: input, shape index: {}]   ;;  %s1063_s1 = inlined_call_operand.vmem [shape: f32[16,16], index: 1, kind: input, shape index: {}]   ;;  %s1064_s2 = inlined_call_operand.vmem [shape: f32[16,16], index: 2, kind: input, shape index: {}]   ;;  %s1065_s3 = inlined_call_operand.vmem [shape: f32[4,32], index: 3, kind: input, shape index: {}]   ;;  %s1066_s4 = inlined_call_operand.vmem [shape: f32[4,32], index: 4, kind: input, shape index: {}]   ;;  %s1067_s5 = inlined_call_operand.vmem [shape: f32[1,32], index: 5, kind: input, shape index: {}]   ;;  %s1068_s6 = inlined_call_operand.vmem [shape: f32[1,32], index: 6, kind: input, shape index: {}]   ;;  %s1069_s7 = inlined_call_operand.hbm [shape: f32[2,16,32], index: 7, kind: output, shape index: {}]  }
   0x1   :  { %v35_v0 = vld [vmem:[%s1062_s0] sm:$0xff]  ;;  %v36_v1 = vld [vmem:[%s1062_s0 + $0x8] sm:$0xff]  ;;  %v792_v4 = vld [vmem:[%s1062_s0 + $0x10] sm:$0xff] }
   0x2   :  { %v27_v2 = vld [vmem:[%s1063_s1] sm:$0xff]  ;;  %v880_v3 = vpack.c.bf16 %v36_v1, %v35_v0  ;;  %v793_v5 = vld [vmem:[%s1062_s0 + $0x18] sm:$0xff] }
   0x3   :  { %836 = vmatprep.mubr.msk.f32.mxu1 %vm37_vm0, %v27_v2 }
   0x4   :  { %12 = vsyncpa [#allocation3], 0  ;;  %881 = vmatprep.subr.bf16.mxu1 %v880_v3  ;;  %v28_v6 = vld [vmem:[%s1063_s1 + $0x8] sm:$0xff]  ;;  %v29_v7 = vld [vmem:[%s1064_s2] sm:$0xff]  ;;  %v888_v8 = vpack.c.bf16 %v793_v5, %v792_v4  ;;  %vm207_vm1 = vcmask 1043456   ;;  %vm200_vm2 = vcmask 31744  }
   0x5   :  { %883 = vmatpush3.bf16.msra.mxu1 %v880_v3  ;;  %v30_v9 = vld [vmem:[%s1064_s2 + $0x8] sm:$0xff]  ;;  %v32_v10 = vld [vmem:[%s1066_s4] sm:$0xf]  ;;  %vm370_vm3 = vcmask 261120  }
   0x6   :  { %885 = vmatprep.subr.bf16.mxu1 %v880_v3  ;;  %846 = vmatprep.subr.msk.mxu0 %vm207_vm1, %v32_v10  ;;  %v31_v11 = vld [vmem:[%s1065_s3] sm:$0xf] }
   0x7   :  { %847 = vmatpush3.msk.msra.mxu0 %vm207_vm1, %v32_v10  ;;  %v790_v57 = vld [vmem:[%s1067_s5] ss:$0 sm:$0xff]  ;;  %s935_s5 = smov [#allocation2]  }
   0x8   :  { %837 = vmatmul.mubr.msk.f32.vlgmr.msra.gmra.mrb[0].mxu1 %vm37_vm0, %v28_v6  ;;  %851 = vmatprep.subr.msk.mxu0 %vm207_vm1, %v31_v11  ;;  %v791_v61 = vld [vmem:[%s1068_s6] ss:$0 sm:$0xff]  ;;  %s769_s6 = sshll.u32 %s935_s5, 4  ;;  %s770_s6 = int_to_ptr.vmem [resolvable:$true] %s769_s6 }
   0x9   :  { %887 = vmatpush3.bf16.msra.mxu1 %v880_v3  ;;  %843 = vmatprep.mubr.msk.f32.mxu1 %vm37_vm0, %v29_v7  ;;  %s911_s20 = scalar_lea.vmem %s770_s6, 512  ;;  %p916_p1 = scmp.lt.s32.totalorder %s770_s6, %s770_s6 }
   0xa   :  { %889 = vmatprep.subr.bf16.mxu1 %v888_v8  ;;  %p912_p0 = scmp.ne.s32.totalorder %s770_s6, %s911_s20  ;;  %p917_p2 = scmp.lt.s32.totalorder %s911_s20, %s911_s20 }
   0xc   :  { %844 = vmatmul.mubr.msk.f32.vlgmr.msra.gmra.mrb[2].mxu1 %vm37_vm0, %v30_v9  ;;  %p918_p3 = por %p917_p2, %p916_p1 }
   0xd   :  { %891 = vmatpush3.bf16.msra.mxu1 %v888_v8  ;;  %860 = vmatprep.mubr.msk.f32.mxu1 %vm37_vm0, %v27_v2 }
   0xe   :  { %893 = vmatprep.subr.bf16.mxu1 %v888_v8  ;;  %p919_p4 = pnand %p918_p3, %p912_p0 }
  0x10   :  { %861 = vmatmul.mubr.msk.f32.vlgmr.msra.gmra.mrb[4].mxu1 %vm37_vm0, %v28_v6 }
  0x11   :  { %895 = vmatpush3.bf16.msra.mxu1 %v888_v8  ;;  %867 = vmatprep.mubr.msk.f32.mxu1 %vm37_vm0, %v29_v7 }
  0x14   :  { %868 = vmatmul.mubr.msk.f32.vlgmr.msra.gmra.mrb[6].mxu1 %vm37_vm0, %v30_v9 }
  0xdb   :  { %v838_v12 = vpop.f32.mrb[0].mxu1 }
  0xdc   :  { %v110_v13 = vpop.f32.mrb[1].mxu1 }
  0xdf   :  { %v845_v14 = vpop.f32.mrb[2].mxu1 }
  0xe0   :  { %v191_v15 = vpop.f32.mrb[3].mxu1 }
  0xe1   :  { %848 = vmatprep.mubr.msk.f32.mxu0 %vm200_vm2, %v191_v15 }
  0xe2   :  { %849 = vmatmul.mubr.msk.f32.vlgmr.msra.gmra.mrb[0].mxu0 %vm200_vm2, %v845_v14 }
  0xe3   :  { %852 = vmatpush3.msk.msra.mxu0 %vm207_vm1, %v31_v11  ;;  %853 = vmatprep.mubr.msk.f32.mxu0 %vm200_vm2, %v110_v13  ;;  %v862_v16 = vpop.f32.mrb[4].mxu1 }
  0xe4   :  { %v485_v17 = vpop.f32.mrb[5].mxu1  ;;  %870 = vmatprep.subr.msk.mxu0 %vm207_vm1, %v32_v10 }
  0xe7   :  { %v869_v18 = vpop.f32.mrb[6].mxu1 }
  0xe8   :  { %v560_v19 = vpop.f32.mrb[7].mxu1 }
  0xea   :  { %854 = vmatmul.mubr.msk.f32.vlgmr.msra.gmra.mrb[0].mxu0 %vm200_vm2, %v838_v12 }
  0xeb   :  { %871 = vmatpush3.msk.msra.mxu0 %vm207_vm1, %v32_v10  ;;  %872 = vmatprep.mubr.msk.f32.mxu0 %vm200_vm2, %v560_v19 }
  0xec   :  { %875 = vmatprep.subr.msk.mxu0 %vm207_vm1, %v31_v11 }
  0xee   :  { %873 = vmatmul.mubr.msk.f32.vlgmr.msra.gmra.mrb[2].mxu0 %vm200_vm2, %v869_v18 }
  0xef   :  { %876 = vmatpush3.msk.msra.mxu0 %vm207_vm1, %v31_v11  ;;  %877 = vmatprep.mubr.msk.f32.mxu0 %vm200_vm2, %v485_v17 }
  0xf6   :  { %878 = vmatmul.mubr.msk.f32.vlgmr.msra.gmra.mrb[2].mxu0 %vm200_vm2, %v862_v16 }
 0x1bd   :  { %v855_v20 = vpop.f32.mrb[0].mxu0 }
 0x1be   :  { %v361_v21 = vpop.f32.mrb[1].mxu0  ;;  %v374_v23 = vsel %vm370_vm3, %v855_v20, 0.0 }
 0x1bf   :  { %v371_v22 = vsel %vm370_vm3, %v361_v21, 0.0 }
 0x1c0   :  { %372 = vadd.xlane.f32.xlu0 %v371_v22 }
 0x1c4   :  { %375 = vadd.xlane.f32.xlu0 %v374_v23 }
 0x1c9   :  { %v879_v24 = vpop.f32.mrb[2].mxu0 }
 0x1ca   :  { %v722_v25 = vpop.f32.mrb[3].mxu0  ;;  %v734_v27 = vsel %vm370_vm3, %v879_v24, 0.0 }
 0x1cb   :  { %v731_v26 = vsel %vm370_vm3, %v722_v25, 0.0 }
 0x1cc   :  { %732 = vadd.xlane.f32.xlu1 %v731_v26 }
 0x1d0   :  { %735 = vadd.xlane.f32.xlu1 %v734_v27 }
 0x24d   :  { %v373_v28 = vpop.xlane.xlu0 %372 }
 0x24e   :  { %v378_v29 = vmul.f32 0.03125, %v373_v28 }
 0x250   :  { %v380_v30 = vsub.f32 %v361_v21, %v378_v29 }
 0x251   :  { %v376_v31 = vpop.xlane.xlu0 %375 }
 0x252   :  { %v379_v32 = vmul.f32 0.03125, %v376_v31  ;;  %v382_v33 = vmul.f32 %v380_v30, %v380_v30 }
 0x254   :  { %v381_v34 = vsub.f32 %v855_v20, %v379_v32  ;;  %v384_v35 = vsel %vm370_vm3, %v382_v33, 0.0 }
 0x255   :  { %385 = vadd.xlane.f32.xlu0 %v384_v35 }
 0x256   :  { %v383_v36 = vmul.f32 %v381_v34, %v381_v34 }
 0x258   :  { %v387_v37 = vsel %vm370_vm3, %v383_v36, 0.0 }
 0x259   :  { %v733_v38 = vpop.xlane.xlu1 %732  ;;  %388 = vadd.xlane.f32.xlu1 %v387_v37 }
 0x25a   :  { %v737_v39 = vmul.f32 0.03125, %v733_v38 }
 0x25c   :  { %v739_v40 = vsub.f32 %v722_v25, %v737_v39 }
 0x25d   :  { %v736_v41 = vpop.xlane.xlu1 %735 }
 0x25e   :  { %v738_v42 = vmul.f32 0.03125, %v736_v41  ;;  %v741_v43 = vmul.f32 %v739_v40, %v739_v40 }
 0x260   :  { %v740_v44 = vsub.f32 %v879_v24, %v738_v42  ;;  %v743_v45 = vsel %vm370_vm3, %v741_v43, 0.0 }
 0x261   :  { %744 = vadd.xlane.f32.xlu0 %v743_v45 }
 0x262   :  { %v742_v46 = vmul.f32 %v740_v44, %v740_v44 }
 0x264   :  { %v746_v47 = vsel %vm370_vm3, %v742_v46, 0.0 }
 0x265   :  { %747 = vadd.xlane.f32.xlu1 %v746_v47 }
 0x2e2   :  { %v386_v48 = vpop.xlane.xlu0 %385 }
 0x2e3   :  { %v390_v49 = vmul.f32 0.03125, %v386_v48 }
 0x2e5   :  { %v392_v50 = vadd.f32 1e-05, %v390_v49 }
 0x2e6   :  { %v389_v51 = vpop.xlane.xlu1 %388 }
 0x2e7   :  { %903 = vrsqrt.f32 %v392_v50  ;;  %v391_v52 = vmul.f32 0.03125, %v389_v51 }
 0x2e9   :  { %v393_v53 = vadd.f32 1e-05, %v391_v52 }
 0x2eb   :  { %905 = vrsqrt.f32 %v393_v53 }
 0x2ee   :  { %v745_v54 = vpop.xlane.xlu0 %744 }
 0x2ef   :  { %v749_v55 = vmul.f32 0.03125, %v745_v54 }
 0x2f1   :  { %v904_v56 = vpop.eup %903  ;;  %v751_v58 = vadd.f32 1e-05, %v749_v55 }
 0x2f2   :  { %v396_v59 = vmul.f32 %v904_v56, %v380_v30  ;;  %v748_v60 = vpop.xlane.xlu1 %747 }
 0x2f3   :  { %907 = vrsqrt.f32 %v751_v58  ;;  %v750_v62 = vmul.f32 0.03125, %v748_v60 }
 0x2f4   :  { %v404_v63 = vmul.f32 %v790_v57, %v396_v59 }
 0x2f5   :  { %v906_v0 = vpop.eup %905  ;;  %v752_v1 = vadd.f32 1e-05, %v750_v62 }
 0x2f6   :  { %v412_v2 = vadd.f32 %v791_v61, %v404_v63  ;;  %v397_v3 = vmul.f32 %v906_v0, %v381_v34 }
 0x2f7   :  { %909 = vrsqrt.f32 %v752_v1 }
 0x2f8   :  { %414 = vst.msk [vmem:[#allocation2] sm:$0xff] %vm370_vm3, %v412_v2  ;;  %v405_v4 = vmul.f32 %v790_v57, %v397_v3 }
 0x2fa   :  { %v413_v5 = vadd.f32 %v791_v61, %v405_v4 }
 0x2fc   :  { %415 = vst.msk [vmem:[#allocation2 + $0x8] sm:$0xff] %vm370_vm3, %v413_v5 }
 0x2fd   :  { %v908_v6 = vpop.eup %907 }
 0x2fe   :  { %v755_v7 = vmul.f32 %v908_v6, %v739_v40 }
 0x300   :  { %v757_v8 = vmul.f32 %v790_v57, %v755_v7 }
 0x301   :  { %v910_v9 = vpop.eup %909 }
 0x302   :  { %v759_v10 = vadd.f32 %v791_v61, %v757_v8  ;;  %v756_v11 = vmul.f32 %v910_v9, %v740_v44 }
 0x304   :  { %762 = vst.msk [vmem:[#allocation2 + $0x10] sm:$0xff] %vm370_vm3, %v759_v10  ;;  %v758_v12 = vmul.f32 %v790_v57, %v756_v11 }
 0x306   :  { %v760_v13 = vadd.f32 %v791_v61, %v758_v12 }
 0x308   :  { %763 = vst.msk [vmem:[#allocation2 + $0x18] sm:$0xff] %vm370_vm3, %v760_v13 }
 0x309   :  { %922 = shalt.err (!%p919_p4)
}
 0x30a   :  { %s923_s23 = scalar_lea.hbm %s1069_s7, 512 }
 0x30b   :  { %p924_p5 = scmp.ne.s32.totalorder %s1069_s7, %s923_s23  ;;  %p927_p6 = scmp.lt.u32.totalorder %s923_s23, %s1069_s7 }
 0x30d   :  { %p929_p7 = pnand %p927_p6, %p924_p5 }
 0x30f   :  { %932 = shalt.err (!%p929_p7)
}
 0x310   :  { %s936_s28 = smov 128   ;;  %s937_s29 = smov 8  }
 0x311   :  { %775 = dma.vmem_to_hbm [thread:$0]  %s770_s6, 512, %s1069_s7, [#allocation3], %s936_s28, %s936_s28, %s937_s29  }
 0x312   :  { %933 = dma.done.wait [#allocation3], 512  }
 0x313   :  { %934 = vsyncadd [#allocation3], 4294966784 }
 0x314   :  { %779 = vsyncpa [#allocation3], 1 }

</bundles_post_ra>
